<compile_context>
chip_gen: v7x
topology: tpu7x:2x2x1
jax: 0.10.0
libtpu: 0.0.40
codegen_flags: <defaults>
</compile_context>

<pallas_src>
import functools

import jax
import jax.numpy as jnp
from jax.experimental import pallas as pl
from jax.experimental.pallas import tpu as pltpu


def _edge_mlp_kernel(xT_ref, w1_ref, b1_ref, w2_ref, b2_ref, o_ref):
    """Fused 2-layer edge MLP on one tile of edges.

    xT_ref : [2h, tile_e] bf16  transposed concat([h_src, h_dst]) edge features
    w1_ref : [h, 2h]      bf16  torch W1.weight layout (out_feat x in_feat)
    b1_ref : [h, 1]       f32
    w2_ref : [h, 1]       f32   torch W2.weight ([1, h]) transposed
    b2_ref : [1, 1]       f32   (SMEM scalar)
    o_ref  : [1, tile_e]  f32   edge scores (lane-dense)
    """
    # Layer 1: single fused MXU matmul over K = 2h, f32 accumulation.
    hidden = jnp.dot(w1_ref[...], xT_ref[...],
                     preferred_element_type=jnp.float32)        # [h, tile_e] f32
    hidden = jnp.maximum(hidden + b1_ref[...], 0.0)             # bias + ReLU (f32)

    # Layer 2 (h -> 1): VPU multiply + sublane reduce -> lane-dense [1, tile_e].
    score = jnp.sum(hidden * w2_ref[...], axis=0, keepdims=True) + b2_ref[0, 0]
    o_ref[...] = score


def _round_up(x, m):
    return ((x + m - 1) // m) * m


def mlp_predictor_forward(src, dst, h, params, *, tile_e=4096):
    """Edge scores for edges (src[i], dst[i]) given node features h [N, h_feats]."""
    n_edges = src.shape[0]
    hf = h.shape[1]

    if n_edges == 0:                                            # zero-size grid guard
        return jnp.zeros((0,), jnp.float32)

    # Cap tile_e for small edge sets (keep >= ~8 grid tiles for v7x's 2 TCs),
    # keep it a multiple of 128, and never below 128.
    tile_e = min(tile_e, _round_up(pl.cdiv(n_edges, 8), 128))
    tile_e = max(128, _round_up(tile_e, 128))
    e_pad = _round_up(n_edges, tile_e)

    # Cheap wrapper-side prep: bf16 transposed node table, pad the *indices*
    # (not the big edge matrix), and gather columns directly into the
    # lane-major [2h, E_pad] layout the kernel wants.
    hT = h.T.astype(jnp.bfloat16)                               # [hf, N] bf16 (tiny)
    src_p = jnp.pad(src, (0, e_pad - n_edges))
    dst_p = jnp.pad(dst, (0, e_pad - n_edges))
    xT = jnp.concatenate([hT[:, src_p], hT[:, dst_p]], axis=0)  # [2h, E_pad] bf16

    w1 = params["w1"].astype(jnp.bfloat16)                      # [h, 2h]
    b1 = params["b1"].reshape(hf, 1).astype(jnp.float32)        # [h, 1]
    w2 = params["w2"].reshape(hf, 1).astype(jnp.float32)        # [h, 1]  (W2.T)
    b2 = params["b2"].reshape(1, 1).astype(jnp.float32)         # [1, 1]

    grid = (e_pad // tile_e,)
    out = pl.pallas_call(
        _edge_mlp_kernel,
        out_shape=jax.ShapeDtypeStruct((1, e_pad), jnp.float32),
        grid=grid,
        in_specs=[
            pl.BlockSpec((2 * hf, tile_e), lambda i: (0, i)),   # edge features
            pl.BlockSpec((hf, 2 * hf), lambda i: (0, 0)),       # W1
            pl.BlockSpec((hf, 1), lambda i: (0, 0)),            # b1
            pl.BlockSpec((hf, 1), lambda i: (0, 0)),            # W2^T
            pl.BlockSpec(memory_space=pltpu.MemorySpace.SMEM),  # b2 scalar
        ],
        out_specs=pl.BlockSpec((1, tile_e), lambda i: (0, i)),
        compiler_params=pltpu.CompilerParams(
            dimension_semantics=("parallel",)),                 # megacore on v7x
    )(xT, w1, b1, w2, b2)

    # Padded tail columns hold garbage (scores of edge (0,0)); never read them.
    return out[0, :n_edges]                                     # [E] edge scores


def reference_forward(src, dst, h, params):
    """Pure-JAX f32 reference matching the PyTorch module."""
    x = jnp.concatenate([h[src], h[dst]], axis=1)               # [E, 2h]
    hid = jnp.maximum(x @ params["w1"].T + params["b1"], 0.0)   # [E, h]
    return (hid @ params["w2"].T + params["b2"])[:, 0]          # [E]


def init_params(key, h_feats):
    """Mimic torch.nn.Linear default init (uniform +/- 1/sqrt(fan_in))."""
    ks = jax.random.split(key, 4)
    s1 = 1.0 / jnp.sqrt(2.0 * h_feats)
    s2 = 1.0 / jnp.sqrt(1.0 * h_feats)
    return {
        "w1": jax.random.uniform(ks[0], (h_feats, 2 * h_feats), jnp.float32, -s1, s1),
        "b1": jax.random.uniform(ks[1], (h_feats,), jnp.float32, -s1, s1),
        "w2": jax.random.uniform(ks[2], (1, h_feats), jnp.float32, -s2, s2),
        "b2": jax.random.uniform(ks[3], (1,), jnp.float32, -s2, s2),
    }


if __name__ == "__main__":
    key = jax.random.PRNGKey(0)
    k_h, k_src, k_dst, k_p = jax.random.split(key, 4)

    n_nodes, h_feats, n_edges = 64, 32, 500
    h = jax.random.normal(k_h, (n_nodes, h_feats), jnp.float32)
    src = jax.random.randint(k_src, (n_edges,), 0, n_nodes, jnp.int32)
    dst = jax.random.randint(k_dst, (n_edges,), 0, n_nodes, jnp.int32)
    params = init_params(k_p, h_feats)

    fwd = jax.jit(functools.partial(mlp_predictor_forward, tile_e=4096))
    score = jax.block_until_ready(fwd(src, dst, h, params))

    assert score.shape == (n_edges,) and score.dtype == jnp.float32

    ref = reference_forward(src, dst, h, params)
    max_err = float(jnp.max(jnp.abs(score - ref)))
    # bf16 inputs / f32 accumulation: absolute tol with a relative fallback
    # so the check stays meaningful for larger h_feats / activation scales.
    tol = max(0.15, 0.02 * (1.0 + float(jnp.max(jnp.abs(ref)))))
    assert max_err < tol, f"mismatch vs reference: max abs err {max_err}"

    print("KERNEL_OK")
</pallas_src>

<mosaic_0001>
module attributes {stable_mosaic.version = 11 : i64} {
  func.func @_edge_mlp_kernel(%arg0: i32, %arg1: memref<64x128xbf16, #tpu.memory_space<vmem>>, %arg2: memref<32x64xbf16, #tpu.memory_space<vmem>>, %arg3: memref<32x1xf32, #tpu.memory_space<vmem>>, %arg4: memref<32x1xf32, #tpu.memory_space<vmem>>, %arg5: memref<1x1xf32, #tpu.memory_space<smem>>, %arg6: memref<1x128xf32, #tpu.memory_space<vmem>>) attributes {dimension_semantics = [#tpu.dimension_semantics<parallel>], iteration_bounds = array<i64: 4>, scalar_prefetch = 0 : i64, scratch_operands = 0 : i64, tpu.core_type = #tpu.core_type<tc>, window_params = [{transform_indices = @transform_0, window_bounds = array<i64: 64, 128>}, {pipeline_mode = #tpu.pipeline_mode<synchronous>, transform_indices = @transform_1, window_bounds = array<i64: 32, 64>}, {pipeline_mode = #tpu.pipeline_mode<synchronous>, transform_indices = @transform_2, window_bounds = array<i64: 32, 1>}, {pipeline_mode = #tpu.pipeline_mode<synchronous>, transform_indices = @transform_3, window_bounds = array<i64: 32, 1>}, {transform_indices = @transform_4, window_bounds = array<i64: 1, 1>}, {transform_indices = @transform_5, window_bounds = array<i64: 1, 128>}]} {
    %c0 = arith.constant 0 : index
    %c0_0 = arith.constant 0 : index
    %0 = vector.load %arg2[%c0, %c0_0] : memref<32x64xbf16, #tpu.memory_space<vmem>>, vector<32x64xbf16>
    %c0_1 = arith.constant 0 : index
    %c0_2 = arith.constant 0 : index
    %1 = vector.load %arg1[%c0_1, %c0_2] : memref<64x128xbf16, #tpu.memory_space<vmem>>, vector<64x128xbf16>
    %cst = arith.constant dense<0.000000e+00> : vector<32x128xf32>
    %2 = tpu.matmul %0, %1, %cst {dimension_numbers = #tpu.dot_dimension_numbers<[1], [0], [0], [1], [0, 0, 1, 1], [], []>} : vector<32x64xbf16>, vector<64x128xbf16>, vector<32x128xf32> -> vector<32x128xf32>
    %c0_3 = arith.constant 0 : index
    %c0_4 = arith.constant 0 : index
    %3 = vector.load %arg3[%c0_3, %c0_4] : memref<32x1xf32, #tpu.memory_space<vmem>>, vector<32x1xf32>
    %4 = vector.broadcast %3 : vector<32x1xf32> to vector<32x128xf32>
    %5 = arith.addf %2, %4 : vector<32x128xf32>
    %cst_5 = arith.constant 0.000000e+00 : f32
    %6 = vector.broadcast %cst_5 : f32 to vector<32x128xf32>
    %7 = arith.maximumf %5, %6 : vector<32x128xf32>
    %c0_6 = arith.constant 0 : index
    %c0_7 = arith.constant 0 : index
    %8 = vector.load %arg4[%c0_6, %c0_7] : memref<32x1xf32, #tpu.memory_space<vmem>>, vector<32x1xf32>
    %9 = vector.broadcast %8 : vector<32x1xf32> to vector<32x128xf32>
    %10 = arith.mulf %7, %9 : vector<32x128xf32>
    %cst_8 = arith.constant dense<0.000000e+00> : vector<128xf32>
    %11 = vector.multi_reduction <add>, %10, %cst_8 [0] : vector<32x128xf32> to vector<128xf32>
    %12 = vector.shape_cast %11 : vector<128xf32> to vector<1x128xf32>
    %c0_9 = arith.constant 0 : index
    %c0_10 = arith.constant 0 : index
    %13 = memref.load %arg5[%c0_9, %c0_10] : memref<1x1xf32, #tpu.memory_space<smem>>
    %14 = vector.broadcast %13 : f32 to vector<1x128xf32>
    %15 = arith.addf %12, %14 : vector<1x128xf32>
    %c0_11 = arith.constant 0 : index
    %c0_12 = arith.constant 0 : index
    %16 = vector.load %arg6[%c0_11, %c0_12] : memref<1x128xf32, #tpu.memory_space<vmem>>, vector<1x128xf32>
    tpu.vector_store %arg6[%c0_11, %c0_12], %15 {strides = array<i32>} : memref<1x128xf32, #tpu.memory_space<vmem>>, vector<1x128xf32>,
    return
  }
  func.func @transform_0(%arg0: i32) -> (i32, i32) {
    %c0_i32 = arith.constant 0 : i32
    %c0_i32_0 = arith.constant 0 : i32
    return %c0_i32, %arg0 : i32, i32
  }
  func.func @transform_1(%arg0: i32) -> (i32, i32) {
    %c0_i32 = arith.constant 0 : i32
    %c0_i32_0 = arith.constant 0 : i32
    %c0_i32_1 = arith.constant 0 : i32
    return %c0_i32, %c0_i32_0 : i32, i32
  }
  func.func @transform_2(%arg0: i32) -> (i32, i32) {
    %c0_i32 = arith.constant 0 : i32
    %c0_i32_0 = arith.constant 0 : i32
    %c0_i32_1 = arith.constant 0 : i32
    return %c0_i32, %c0_i32_0 : i32, i32
  }
  func.func @transform_3(%arg0: i32) -> (i32, i32) {
    %c0_i32 = arith.constant 0 : i32
    %c0_i32_0 = arith.constant 0 : i32
    %c0_i32_1 = arith.constant 0 : i32
    return %c0_i32, %c0_i32_0 : i32, i32
  }
  func.func @transform_4(%arg0: i32) -> (i32, i32) {
    %c0_i32 = arith.constant 0 : i32
    %c0_i32_0 = arith.constant 0 : i32
    %c0_i32_1 = arith.constant 0 : i32
    return %c0_i32, %c0_i32_0 : i32, i32
  }
  func.func @transform_5(%arg0: i32) -> (i32, i32) {
    %c0_i32 = arith.constant 0 : i32
    %c0_i32_0 = arith.constant 0 : i32
    return %c0_i32, %arg0 : i32, i32
  }
}

</mosaic_0001>

<bundles_post_ra>
// kernel: mlp_predictor_forward.1
= control target key start
LH: loop header
LB: loop body
LE: loop exit
PB: predicated region body
PF: predicated region fallthrough
CT: control target
= control target key end

     0   :  { %s860_s0 = inlined_call_operand.vmem [shape: bf16[64,512], index: 0, kind: input, shape index: {}]   ;;  %s861_s1 = inlined_call_operand.vmem [shape: bf16[32,64], index: 1, kind: input, shape index: {}]   ;;  %s862_s2 = inlined_call_operand.vmem [shape: f32[32,1], index: 2, kind: input, shape index: {}]   ;;  %s863_s3 = inlined_call_operand.vmem [shape: f32[32,1], index: 3, kind: input, shape index: {}]   ;;  %s864_s4 = inlined_call_operand.<no memory space> [shape: f32[1,1], index: 4, kind: input, shape index: {}]   ;;  %s865_s5 = inlined_call_operand.hbm [shape: f32[1,512], index: 5, kind: output, shape index: {}]  }
   0x1   :  { %10 = sst [smem:[#allocation2]] %s864_s4 }
   0x2   :  { %11 = vsyncpa [#allocation5], 0 }
   0x3   :  { %13 = vsyncpa [#allocation5 + $0x1], 0  ;;  %s721_s20 = smov 0   ;;  %s723_s21 = smov 0  }
   0x4   :  { %s725_s22 = smov 0   ;;  %s727_s23 = smov 0  }
   0x5 LB: > { %s537_s4 = sadd.s32 4294967295, %s684_s23   ;;  %s538_s24 = sadd.s32 4294967294, %s684_s23   ;;  %s684_s23 = sphi %s727_s23, %s871_s23   ;;  %s680_s22 = sphi %s725_s22, %s870_s22   ;;  %s676_s21 = sphi %s723_s21, %s869_s21   ;;  %s672_s20 = sphi %s721_s20, %s868_s20  }
   0x6   : > { %s744_s25 = sadd.s32 1, %s684_s23   ;;  %s26_s26 = sadd.s32 1, %s680_s22 }
   0x7   : > { %s23_s27 = ssub.s32 %s684_s23, %s744_s25  ;;  %p33_p0 = scmp.ne.s32.totalorder %s680_s22, %s676_s21 }
   0x8   : > { %p24_p1 = scmp.eq.s32.totalorder %s23_s27, 0  ;;  %p34_p2 = scmp.eq.s32.totalorder %s684_s23, 0 }
   0x9   : > { %p147_p3 = scmp.eq.s32.totalorder %s537_s4, 3  ;;  %p152_p4 = scmp.ne.s32.totalorder %s676_s21, %s672_s20 }
   0xa   : > { %s757_s28 = scalar_select %p24_p1, %s680_s22, %s26_s26  }
   0xb   : > { %p35_p5 = por %p34_p2, %p33_p0  ;;  %p759_p6 = por %p147_p3, %p33_p0 }
   0xc   : > { %p153_p7 = scmp.eq.s32.totalorder %s538_s24, 3  ;;  %p540_p9 = scmp.ge.s32.totalorder %s684_s23, 4 }
   0xe   : > { %p763_p8 = por %p153_p7, %p152_p4  ;;  %181 = sbr.rel (%p540_p9) target bundleno = 30 (0x1e), region = 32 }
  0x15   : > { %184 = sbr.rel (!%p35_p5) target bundleno = 30 (0x1e), region = 36  ;;  %s186_s6 = sand.u32 (%p35_p5), 1, %s680_s22  }
  0x16   : > { %s542_s7 = sshll.u32 (%p35_p5), %s684_s23, 2  ;;  %s541_s8 = sshll.u32 (%p35_p5), %s186_s6, 5 }
  0x17   : > { %s190_s11 = scalar_lea.vmem (%p35_p5), %s860_s0, %s542_s7  ;;  %s188_s12 = scalar_lea.vmem (%p35_p5), [#allocation3], %s541_s8 }
  0x18   : > { %v206_v0 = vld [vmem:[%s190_s11] sm:$0xf] (%p35_p5)  ;;  %v208_v1 = vld [vmem:[%s190_s11 + $0x10] sm:$0xf] (%p35_p5) }
  0x19   : > { %207 = vst [vmem:[%s188_s12] sm:$0xf] (%p35_p5), %v206_v0  ;;  %209 = vst [vmem:[%s188_s12 + $0x4] sm:$0xf] (%p35_p5), %v208_v1  ;;  %v210_v2 = vld [vmem:[%s190_s11 + $0x20] sm:$0xf] (%p35_p5) }
  0x1a   : > { %v212_v3 = vld [vmem:[%s190_s11 + $0x30] sm:$0xf] (%p35_p5)  ;;  %v214_v4 = vld [vmem:[%s190_s11 + $0x40] sm:$0xf] (%p35_p5)  ;;  %211 = vst [vmem:[%s188_s12 + $0x8] sm:$0xf] (%p35_p5), %v210_v2 }
  0x1b   : > { %213 = vst [vmem:[%s188_s12 + $0xc] sm:$0xf] (%p35_p5), %v212_v3  ;;  %215 = vst [vmem:[%s188_s12 + $0x10] sm:$0xf] (%p35_p5), %v214_v4  ;;  %v216_v5 = vld [vmem:[%s190_s11 + $0x50] sm:$0xf] (%p35_p5) }
  0x1c   : > { %v218_v6 = vld [vmem:[%s190_s11 + $0x60] sm:$0xf]  ;;  %v220_v7 = vld [vmem:[%s190_s11 + $0x70] sm:$0xf]  ;;  %217 = vst [vmem:[%s188_s12 + $0x14] sm:$0xf] %v216_v5 }
  0x1d   : > { %219 = vst [vmem:[%s188_s12 + $0x18] sm:$0xf] %v218_v6  ;;  %221 = vst [vmem:[%s188_s12 + $0x1c] sm:$0xf] %v220_v7 }
  0x1e PF: > { %p543_p10 = scmp.ge.s32.totalorder %s684_s23, 1  ;;  %p259_p11 = scmp.lt.s32.totalorder %s684_s23, 5 }
  0x20   : > { %p260_p12 = pnand %p543_p10, %p259_p11 }
  0x21   : > { %s776_s13 = sand.u32 (!%p260_p12), 1, %s676_s21   ;;  %v620_v8 = vld [vmem:[%s861_s1] sm:$0xff] (!%p260_p12)   ;;  %vm363_vm0 = vcmask (!%p260_p12), 523264   ;;  %v307_v10 = vld [vmem:[%s862_s2 + $0x10] sm:$0xff] (!%p260_p12)  ;;  %v686_v12 = vmov (!%p260_p12), 0   ;;  %v306_v15 = vld [vmem:[%s862_s2 + $0x8] sm:$0xff] (!%p260_p12) }
  0x22   : > { %263 = sbr.rel (%p260_p12) target bundleno = 308 (0x134), region = 77  ;;  %s544_s16 = sshll.u32 (!%p260_p12), %s776_s13, 5  ;;  %570 = vmatprep.mubr.msk.bf16.mxu0 (!%p260_p12), %vm363_vm0, %v620_v8  ;;  %v305_v9 = vld [vmem:[%s862_s2] sm:$0xff] (!%p260_p12)  ;;  %614 = vset.pattern.permute.xlu0 (!%p260_p12), %v686_v12  ;;  %v308_v16 = vld [vmem:[%s862_s2 + $0x18] sm:$0xff] (!%p260_p12)  ;;  %v424_v18 = vld [vmem:[%s863_s3 + $0x8] sm:$0xff] (!%p260_p12) }
  0x23   : > { %s268_s26 = scalar_lea.vmem (!%p260_p12), [#allocation3], %s544_s16  ;;  %615 = vset.pattern.permute.xlu1 (!%p260_p12), %v686_v12  ;;  %311 = vperm.xlu0 (!%p260_p12), %614, %v305_v9   ;;  %v423_v17 = vld [vmem:[%s863_s3] sm:$0xff] (!%p260_p12)  ;;  %v425_v20 = vld [vmem:[%s863_s3 + $0x10] sm:$0xff] (!%p260_p12)  ;;  %v426_v21 = vld [vmem:[%s863_s3 + $0x18] sm:$0xff] (!%p260_p12)  ;;  %s460_s24 = sld [smem:[#allocation2]] (!%p260_p12) }
  0x24   : > { %v616_v11 = vld [vmem:[%s268_s26] sm:$0xff] (!%p260_p12)   ;;  %v617_v13 = vld [vmem:[%s268_s26 + $0x8] sm:$0xff] (!%p260_p12)   ;;  %321 = vperm.xlu1 (!%p260_p12), %615, %v307_v10   ;;  %v618_v14 = vld [vmem:[%s268_s26 + $0x10] sm:$0xff] (!%p260_p12)   ;;  %s291_s27 = scalar_lea.vmem (!%p260_p12), [#allocation4], %s776_s13  ;;  %s465_s10 = scalar_lea.sflag (!%p260_p12), [#allocation5], %s776_s13 }
  0x25   : > { %562 = vmatprep.subr.bf16.mxu0 (!%p260_p12), %v616_v11  ;;  %v619_v19 = vld [vmem:[%s268_s26 + $0x18] sm:$0xff] (!%p260_p12)   ;;  %v621_v22 = vld [vmem:[%s861_s1 + $0x8] sm:$0xff] (!%p260_p12)   ;;  %s553_s26 = sshll.u32 (!%p260_p12), %s537_s4, 4  ;;  %s477_s6 = sshll.u32 (!%p260_p12), %s291_s27, 4  ;;  %s819_s6 = int_to_ptr.vmem [resolvable:$true] %s477_s6 }
  0x26   : > { %563 = vmatpush3.bf16.msra.mxu0 (!%p260_p12), %v616_v11  ;;  %s817_s9 = scalar_lea.hbm (!%p260_p12), %s865_s5, %s553_s26  ;;  %s622_s11 = scalar_lea.vmem (!%p260_p12), %s819_s6, 16 }
  0x27   : > { %564 = vmatprep.subr.bf16.mxu0 (!%p260_p12), %v617_v13  ;;  %316 = vperm.xlu0 (!%p260_p12), %614, %v306_v15   ;;  %p623_p13 = scmp.ne.s32.totalorder (!%p260_p12), %s819_s6, %s622_s11  ;;  %s687_s4 = smov (!%p260_p12), [#allocation4]  }
  0x28   : > { %326 = vperm.xlu1 (!%p260_p12), %615, %v308_v16   ;;  %s626_s12 = sshll.u32 (!%p260_p12), %s687_s4, 4  ;;  %s627_s12 = int_to_ptr.vmem [resolvable:$false] %s626_s12 }
  0x29   : > { %v461_v55 = vstv %s460_s24  ;;  %p624_p0 = pnand %p623_p13, %p759_p6  ;;  %s628_s14 = scalar_lea.vmem %s627_s12, 32 }
  0x2a   : > { %565 = vmatpush3.bf16.msra.mxu0 %v617_v13  ;;  %p629_p2 = scmp.lt.s32.totalorder %s819_s6, %s627_s12  ;;  %p630_p3 = scmp.lt.s32.totalorder %s628_s14, %s622_s11 }
  0x2b   : > { %566 = vmatprep.subr.bf16.mxu0 %v618_v14  ;;  %429 = vperm.xlu0 %614, %v423_v17   ;;  %p625_p1 = pneg %p624_p0 }
  0x2c   : > { %434 = vperm.xlu1 %615, %v424_v18   ;;  %p631_p4 = por %p630_p3, %p629_p2 }
  0x2e   : > { %567 = vmatpush3.bf16.msra.mxu0 %v618_v14  ;;  %p632_p5 = pnand %p631_p4, %p625_p1 }
  0x2f   : > { %568 = vmatprep.subr.bf16.mxu0 %v619_v19  ;;  %439 = vperm.xlu0 %614, %v425_v20  }
  0x30   : > { %444 = vperm.xlu1 %615, %v426_v21  }
  0x32   : > { %569 = vmatpush3.bf16.msra.mxu0 %v619_v19 }
  0x35   : > { %571 = vmatmul.mubr.msk.bf16.vlgmr.msra.gmra.mrb[0].mxu0 %vm363_vm0, %v621_v22 }
  0xa2   : > { %v312_v23 = vpop.permute.xlu0 %311 }
  0xa3   : > { %v322_v24 = vpop.permute.xlu1 %321 }
  0xa6   : > { %v317_v25 = vpop.permute.xlu0 %316 }
  0xa7   : > { %v327_v26 = vpop.permute.xlu1 %326 }
  0xaa   : > { %v430_v32 = vpop.permute.xlu0 %429 }
  0xab   : > { %v435_v37 = vpop.permute.xlu1 %434 }
  0xae   : > { %v440_v43 = vpop.permute.xlu0 %439 }
  0xaf   : > { %v445_v46 = vpop.permute.xlu1 %444 }
 0x108   : > { %v572_v27 = vpop.f32.mrb[0].mxu0 }
 0x109   : > { %v404_v28 = vpop.f32.mrb[1].mxu0  ;;  %v413_v29 = vadd.f32 %v572_v27, %v322_v24 }
 0x10a   : > { %v405_v30 = vadd.f32 %v404_v28, %v312_v23  ;;  %v573_v31 = vpop.f32.mrb[2].mxu0 }
 0x10b   : > { %v407_v33 = vpop.f32.mrb[3].mxu0  ;;  %v416_v35 = vadd.f32 %v573_v31, %v327_v26  ;;  %v421_v38 = vmax.f32 %v413_v29, 0.0 }
 0x10c   : > { %v419_v34 = vmax.f32 %v405_v30, 0.0  ;;  %v408_v36 = vadd.f32 %v407_v33, %v317_v25 }
 0x10d   : > { %v422_v41 = vmax.f32 %v416_v35, 0.0  ;;  %v449_v44 = vmul.f32 %v440_v43, %v421_v38 }
 0x10e   : > { %v420_v39 = vmax.f32 %v408_v36, 0.0  ;;  %v447_v40 = vmul.f32 %v430_v32, %v419_v34 }
 0x10f   : > { %v450_v47 = vmul.f32 %v445_v46, %v422_v41 }
 0x110   : > { %v448_v42 = vmul.f32 %v435_v37, %v420_v39 }
 0x112   : > { %v451_v45 = vadd.f32 %v448_v42, %v447_v40 }
 0x114   : > { %v452_v48 = vadd.f32 %v451_v45, %v449_v44 }
 0x116   : > { %v453_v49 = vadd.f32 %v452_v48, %v450_v47 }
 0x118   : > { %v454_v50 = vrot.slane %v453_v49, 4 }
 0x11a   : > { %v455_v51 = vadd.f32 %v454_v50, %v453_v49 }
 0x11c   : > { %v456_v52 = vrot.slane %v455_v51, 2 }
 0x11e   : > { %v457_v53 = vadd.f32 %v456_v52, %v455_v51 }
 0x120   : > { %v458_v54 = vrot.slane %v457_v53, 1 }
 0x122   : > { %v459_v56 = vadd.f32 %v458_v54, %v457_v53 }
 0x124   : > { %v462_v57 = vadd.f32 %v461_v55, %v459_v56 }
 0x126   : > { %463 = vst [vmem:[%s291_s27] sm:$0x1] %v462_v57 }
 0x127   : > { %635 = shalt.err (!%p632_p5)
}
 0x128   : > { %s636_s13 = scalar_lea.hbm %s817_s9, 16  ;;  %s640_s17 = scalar_lea.hbm %s865_s5, 64 }
 0x129   : > { %p637_p7 = scmp.ne.s32.totalorder %s817_s9, %s636_s13  ;;  %p641_p11 = scmp.lt.u32.totalorder %s817_s9, %s865_s5 }
 0x12a   : > { %p642_p12 = scmp.lt.u32.totalorder %s640_s17, %s636_s13  ;;  %p644_p0 = scmp.lt.u32.totalorder %s636_s13, %s817_s9 }
 0x12b   : > { %p638_p9 = pnand %p637_p7, %p759_p6 }
 0x12c   : > { %p643_p13 = por %p642_p12, %p641_p11 }
 0x12d   : > { %p639_p10 = pneg %p638_p9 }
 0x12e   : > { %p645_p1 = por %p644_p0, %p643_p13 }
 0x130   : > { %p646_p2 = pnand %p645_p1, %p639_p10 }
 0x132   : > { %649 = shalt.err (!%p646_p2)
}
 0x133   : > { %574 = dma.vmem_to_hbm [thread:$0]  (%p759_p6), %s819_s6, 16, %s817_s9, %s465_s10  }
 0x134 PF: > { %p580_p3 = scmp.ge.s32.totalorder %s684_s23, 2  ;;  %s489_s24 = sand.u32 1, %s672_s20  }
 0x135   : > { %s490_s26 = scalar_lea.sflag [#allocation5], %s489_s24 }
 0x136   : > { %p577_p4 = pnand %p580_p3, %p763_p8 }
 0x138   : > { %667 = dma.done.wait (!%p577_p4), %s490_s26, 16  }
 0x139   : > { %669 = vsyncadd (!%p577_p4), %s490_s26, 4294967280  ;;  %p16_p5 = scmp.ge.s32.totalorder %s744_s25, 6   ;;  %s868_s20 = smov %s676_s21 }
 0x13a   : > { %s869_s21 = smov %s680_s22  ;;  %s870_s22 = smov %s757_s28 }
 0x13b   : > { %s871_s23 = smov %s744_s25  ;;  %18 = sbr.rel (!%p16_p5) target bundleno = 5 (0x5), region = 121 }
 0x142   :  { %494 = vsyncpa [#allocation5], 1 }
 0x143   :  { %496 = vsyncpa [#allocation5 + $0x1], 1 }

</bundles_post_ra>
